<compile_context>
chip_gen: v5e
topology: v5e:2x2
jax: 0.10.0
libtpu: 0.0.40
codegen_flags: <defaults>
</compile_context>

<pallas_src>
import jax
import jax.numpy as jnp
from jax.experimental import pallas as pl
from jax.experimental.pallas import tpu as pltpu

LANE = 128
SUBLANE = 16                       # row multiple safe for both f32 and bf16 x
VMEM_BUDGET = 12 * 1024 * 1024     # conservative, fits every generation


def _round_up(x: int, m: int) -> int:
    return (x + m - 1) // m * m


def _cdiv(a: int, b: int) -> int:
    return -(-a // b)


def mlp_kernel(x_ref, w1_ref, b1_ref, w2_ref, b2_ref, o_ref):
    # x_ref:  (tb, indim_p)        native dtype (f32 here)
    # w1_ref: (indim_p, hidden_p)  bf16    b1_ref: (1, hidden_p) f32
    # w2_ref: (hidden_p, out_p)    bf16    b2_ref: (1, out_p)    f32
    # o_ref:  (tb, out_p)          f32
    x = x_ref[...].astype(jnp.bfloat16)           # cast at the MXU boundary
    h = jnp.dot(x, w1_ref[...], preferred_element_type=jnp.float32)
    h = jnp.maximum(h + b1_ref[...], 0.0)         # bias + ReLU in f32 (VPU)
    y = jnp.dot(h.astype(jnp.bfloat16), w2_ref[...],
                preferred_element_type=jnp.float32)
    o_ref[...] = (y + b2_ref[...]).astype(o_ref.dtype)


def pack_mlp_params(w1, b1, w2, b2):
    """One-time padding + bf16 cast of the weights (call once, reuse)."""
    indim, hidden = w1.shape
    out = w2.shape[1]
    indim_p = _round_up(indim, LANE)
    hidden_p = _round_up(hidden, LANE)
    out_p = _round_up(out, LANE)
    w1_p = jnp.pad(w1, ((0, indim_p - indim),
                        (0, hidden_p - hidden))).astype(jnp.bfloat16)
    b1_p = jnp.pad(b1.reshape(1, hidden),
                   ((0, 0), (0, hidden_p - hidden))).astype(jnp.float32)
    w2_p = jnp.pad(w2, ((0, hidden_p - hidden),
                        (0, out_p - out))).astype(jnp.bfloat16)
    b2_p = jnp.pad(b2.reshape(1, out),
                   ((0, 0), (0, out_p - out))).astype(jnp.float32)
    return {"w1": w1_p, "b1": b1_p, "w2": w2_p, "b2": b2_p,
            "indim": indim, "hidden": hidden, "out": out,
            "indim_p": indim_p, "hidden_p": hidden_p, "out_p": out_p}


def _vmem_bytes(tb, indim_p, hidden_p, out_p, x_itemsize):
    x_tile = tb * indim_p * x_itemsize * 2               # x tile, double-buffered
    o_tile = tb * out_p * 4 * 2                          # out tile, double-buffered
    weights = (indim_p * hidden_p + hidden_p * out_p) * 2  # bf16, single buffer
    biases = (hidden_p + out_p) * 4
    h_scratch = tb * hidden_p * 4                        # f32 intermediate
    return x_tile + o_tile + weights + biases + h_scratch


def mlp_forward(x_batched, params, *, block_b: int = 512):
    """x_batched: (B, ...) array; params: output of pack_mlp_params.
    Returns (B, out) float32."""
    B = x_batched.shape[0]
    indim = params["indim"]
    indim_p, hidden_p, out_p = (params["indim_p"], params["hidden_p"],
                                params["out_p"])
    flat = 1
    for d in x_batched.shape[1:]:
        flat *= d
    assert flat == indim, (flat, indim)

    # nn.Flatten -> row-major flatten of all non-batch dims (metadata only).
    x_flat = x_batched.reshape(B, indim)
    x_itemsize = x_flat.dtype.itemsize

    # Waste-aware batch tile: multiple of SUBLANE, sized so the last tile is
    # never mostly padding.
    n_tiles = max(1, _cdiv(B, max(block_b, SUBLANE)))
    tb = _round_up(_cdiv(B, n_tiles), SUBLANE)
    # Shrink tb if the VMEM footprint would exceed the conservative budget.
    while tb > SUBLANE and _vmem_bytes(tb, indim_p, hidden_p, out_p,
                                       x_itemsize) > VMEM_BUDGET:
        tb = max(SUBLANE, _round_up(tb // 2, SUBLANE))
    # NOTE: for very large flatten sizes (indim >~ 16k) a K grid axis over
    # indim with an f32 accumulator would be needed instead of shrinking tb.

    B_p = _round_up(B, tb)
    if B_p != B or indim_p != indim:
        x_flat = jnp.pad(x_flat, ((0, B_p - B), (0, indim_p - indim)))
    grid = (B_p // tb,)

    # Advisory cost estimate for the XLA scheduler.
    flops = 2 * B_p * indim_p * hidden_p + 2 * B_p * hidden_p * out_p
    bytes_accessed = (B_p * indim_p * x_itemsize                        # x read
                      + (indim_p * hidden_p + hidden_p * out_p) * 2     # weights
                      + (hidden_p + out_p) * 4                          # biases
                      + B_p * out_p * 4)                                # y write
    cost = pl.CostEstimate(flops=flops, transcendentals=0,
                           bytes_accessed=bytes_accessed)

    def resident(shape):
        # Constant index_map -> block never changes; one buffer is enough.
        return pl.BlockSpec(shape, lambda i: (0, 0),
                            pipeline_mode=pl.Buffered(1))

    y_p = pl.pallas_call(
        mlp_kernel,
        out_shape=jax.ShapeDtypeStruct((B_p, out_p), jnp.float32),
        grid=grid,
        in_specs=[
            pl.BlockSpec((tb, indim_p), lambda i: (i, 0)),  # x marches over batch
            resident((indim_p, hidden_p)),                  # W1 (resident)
            resident((1, hidden_p)),                        # b1 (resident)
            resident((hidden_p, out_p)),                    # W2 (resident)
            resident((1, out_p)),                           # b2 (resident)
        ],
        out_specs=pl.BlockSpec((tb, out_p), lambda i: (i, 0)),
        compiler_params=pltpu.CompilerParams(
            dimension_semantics=("parallel",),  # shard batch over v7x's 2 TCs
        ),
        cost_estimate=cost,
    )(x_flat, params["w1"], params["b1"], params["w2"], params["b2"])

    # Strip batch / lane padding.
    return y_p[:B, :params["out"]]


def init_params(key, indim, hidden, out):
    """Deterministic init mirroring nn.Linear (uniform +/- 1/sqrt(fan_in)).
    Weights stored transposed relative to PyTorch Linear.weight: (in, out)."""
    k1, k2, k3, k4 = jax.random.split(key, 4)
    lim1 = 1.0 / jnp.sqrt(indim)
    lim2 = 1.0 / jnp.sqrt(hidden)
    w1 = jax.random.uniform(k1, (indim, hidden), jnp.float32, -lim1, lim1)
    b1 = jax.random.uniform(k2, (hidden,), jnp.float32, -lim1, lim1)
    w2 = jax.random.uniform(k3, (hidden, out), jnp.float32, -lim2, lim2)
    b2 = jax.random.uniform(k4, (out,), jnp.float32, -lim2, lim2)
    return w1, b1, w2, b2


if __name__ == "__main__":
    key = jax.random.PRNGKey(0)
    kx, kp = jax.random.split(key)

    # Small shapes consistent with the module: Flatten over (C,H,W) -> indim.
    B, C, H, W = 2, 4, 8, 8
    indim = C * H * W      # 256
    hidden = 32
    out = 10

    x = jax.random.normal(kx, (B, C, H, W), jnp.float32)
    w1, b1, w2, b2 = init_params(kp, indim, hidden, out)

    # One-time weight packing (pad + bf16 cast), reused for every forward.
    params = pack_mlp_params(w1, b1, w2, b2)

    y = mlp_forward(x, params)
    y = jax.block_until_ready(y)

    # Reference check in plain JAX (f32). Tolerance loosened for bf16 matmuls.
    x_flat = x.reshape(B, indim)
    ref = jnp.maximum(x_flat @ w1 + b1, 0.0) @ w2 + b2
    assert y.shape == (B, out)
    assert jnp.allclose(y, ref, atol=2e-2, rtol=2e-2), (
        float(jnp.max(jnp.abs(y - ref))))

    print("KERNEL_OK")
</pallas_src>

<mosaic_0001>
module attributes {stable_mosaic.version = 11 : i64} {
  func.func @mlp_kernel(%arg0: i32, %arg1: memref<16x256xf32, #tpu.memory_space<vmem>>, %arg2: memref<256x128xbf16, #tpu.memory_space<vmem>>, %arg3: memref<1x128xf32, #tpu.memory_space<vmem>>, %arg4: memref<128x128xbf16, #tpu.memory_space<vmem>>, %arg5: memref<1x128xf32, #tpu.memory_space<vmem>>, %arg6: memref<16x128xf32, #tpu.memory_space<vmem>>) attributes {dimension_semantics = [#tpu.dimension_semantics<parallel>], iteration_bounds = array<i64: 1>, scalar_prefetch = 0 : i64, scratch_operands = 0 : i64, tpu.core_type = #tpu.core_type<tc>, window_params = [{transform_indices = @transform_0, window_bounds = array<i64: 16, 256>}, {pipeline_mode = #tpu.pipeline_mode<synchronous>, transform_indices = @transform_1, window_bounds = array<i64: 256, 128>}, {pipeline_mode = #tpu.pipeline_mode<synchronous>, transform_indices = @transform_2, window_bounds = array<i64: 1, 128>}, {pipeline_mode = #tpu.pipeline_mode<synchronous>, transform_indices = @transform_3, window_bounds = array<i64: 128, 128>}, {pipeline_mode = #tpu.pipeline_mode<synchronous>, transform_indices = @transform_4, window_bounds = array<i64: 1, 128>}, {transform_indices = @transform_5, window_bounds = array<i64: 16, 128>}]} {
    %c0 = arith.constant 0 : index
    %c0_0 = arith.constant 0 : index
    %0 = vector.load %arg1[%c0, %c0_0] : memref<16x256xf32, #tpu.memory_space<vmem>>, vector<16x256xf32>
    %1 = arith.truncf %0 : vector<16x256xf32> to vector<16x256xbf16>
    %c0_1 = arith.constant 0 : index
    %c0_2 = arith.constant 0 : index
    %2 = vector.load %arg2[%c0_1, %c0_2] : memref<256x128xbf16, #tpu.memory_space<vmem>>, vector<256x128xbf16>
    %cst = arith.constant dense<0.000000e+00> : vector<16x128xf32>
    %3 = tpu.matmul %1, %2, %cst {dimension_numbers = #tpu.dot_dimension_numbers<[1], [0], [0], [1], [0, 0, 1, 1], [], []>} : vector<16x256xbf16>, vector<256x128xbf16>, vector<16x128xf32> -> vector<16x128xf32>
    %c0_3 = arith.constant 0 : index
    %c0_4 = arith.constant 0 : index
    %4 = vector.load %arg3[%c0_3, %c0_4] : memref<1x128xf32, #tpu.memory_space<vmem>>, vector<1x128xf32>
    %5 = vector.broadcast %4 : vector<1x128xf32> to vector<16x128xf32>
    %6 = arith.addf %3, %5 : vector<16x128xf32>
    %cst_5 = arith.constant 0.000000e+00 : f32
    %7 = vector.broadcast %cst_5 : f32 to vector<16x128xf32>
    %8 = arith.maximumf %6, %7 : vector<16x128xf32>
    %9 = arith.truncf %8 : vector<16x128xf32> to vector<16x128xbf16>
    %c0_6 = arith.constant 0 : index
    %c0_7 = arith.constant 0 : index
    %10 = vector.load %arg4[%c0_6, %c0_7] : memref<128x128xbf16, #tpu.memory_space<vmem>>, vector<128x128xbf16>
    %cst_8 = arith.constant dense<0.000000e+00> : vector<16x128xf32>
    %11 = tpu.matmul %9, %10, %cst_8 {dimension_numbers = #tpu.dot_dimension_numbers<[1], [0], [0], [1], [0, 0, 1, 1], [], []>} : vector<16x128xbf16>, vector<128x128xbf16>, vector<16x128xf32> -> vector<16x128xf32>
    %c0_9 = arith.constant 0 : index
    %c0_10 = arith.constant 0 : index
    %12 = vector.load %arg5[%c0_9, %c0_10] : memref<1x128xf32, #tpu.memory_space<vmem>>, vector<1x128xf32>
    %13 = vector.broadcast %12 : vector<1x128xf32> to vector<16x128xf32>
    %14 = arith.addf %11, %13 : vector<16x128xf32>
    %c0_11 = arith.constant 0 : index
    %c0_12 = arith.constant 0 : index
    %15 = vector.load %arg6[%c0_11, %c0_12] : memref<16x128xf32, #tpu.memory_space<vmem>>, vector<16x128xf32>
    tpu.vector_store %arg6[%c0_11, %c0_12], %14 {strides = array<i32>} : memref<16x128xf32, #tpu.memory_space<vmem>>, vector<16x128xf32>,
    return
  }
  func.func @transform_0(%arg0: i32) -> (i32, i32) {
    %c0_i32 = arith.constant 0 : i32
    %c0_i32_0 = arith.constant 0 : i32
    return %arg0, %c0_i32 : i32, i32
  }
  func.func @transform_1(%arg0: i32) -> (i32, i32) {
    %c0_i32 = arith.constant 0 : i32
    %c0_i32_0 = arith.constant 0 : i32
    %c0_i32_1 = arith.constant 0 : i32
    return %c0_i32, %c0_i32_0 : i32, i32
  }
  func.func @transform_2(%arg0: i32) -> (i32, i32) {
    %c0_i32 = arith.constant 0 : i32
    %c0_i32_0 = arith.constant 0 : i32
    %c0_i32_1 = arith.constant 0 : i32
    return %c0_i32, %c0_i32_0 : i32, i32
  }
  func.func @transform_3(%arg0: i32) -> (i32, i32) {
    %c0_i32 = arith.constant 0 : i32
    %c0_i32_0 = arith.constant 0 : i32
    %c0_i32_1 = arith.constant 0 : i32
    return %c0_i32, %c0_i32_0 : i32, i32
  }
  func.func @transform_4(%arg0: i32) -> (i32, i32) {
    %c0_i32 = arith.constant 0 : i32
    %c0_i32_0 = arith.constant 0 : i32
    %c0_i32_1 = arith.constant 0 : i32
    return %c0_i32, %c0_i32_0 : i32, i32
  }
  func.func @transform_5(%arg0: i32) -> (i32, i32) {
    %c0_i32 = arith.constant 0 : i32
    %c0_i32_0 = arith.constant 0 : i32
    return %arg0, %c0_i32 : i32, i32
  }
}

</mosaic_0001>

<bundles_post_ra>
// kernel: tpu_custom_call.1
= control target key start
LH: loop header
LB: loop body
LE: loop exit
PB: predicated region body
PF: predicated region fallthrough
CT: control target
= control target key end

     0   :  { %10 = vsyncpa [#allocation3], 0  ;;  %s633_s0 = inlined_call_operand.hbm [shape: f32[16,256], index: 0, kind: input, shape index: {}]   ;;  %s634_s1 = inlined_call_operand.hbm [shape: bf16[256,128], index: 1, kind: input, shape index: {}]   ;;  %s635_s2 = inlined_call_operand.vmem [shape: f32[1,128], index: 2, kind: input, shape index: {}]   ;;  %s636_s3 = inlined_call_operand.hbm [shape: bf16[128,128], index: 3, kind: input, shape index: {}]   ;;  %s637_s4 = inlined_call_operand.vmem [shape: f32[1,128], index: 4, kind: input, shape index: {}]   ;;  %s638_s5 = inlined_call_operand.hbm [shape: f32[16,128], index: 5, kind: output, shape index: {}]  }
   0x1   :  { %11 = vsyncpa [#allocation6], 0  ;;  %s30_s20 = sshll.u32 %s634_s1, 4  ;;  %s31_s20 = int_to_ptr.hbm [resolvable:$true] %s30_s20 }
   0x2   :  { %12 = vsyncpa [#allocation4], 0  ;;  %s575_s21 = smov [#allocation5]   ;;  %s17_s25 = sshll.u32 %s633_s0, 4  ;;  %s18_s25 = int_to_ptr.hbm [resolvable:$true] %s17_s25 }
   0x3   :  { %s32_s22 = sshll.u32 %s575_s21, 4  ;;  %s576_s26 = smov 64   ;;  %s33_s22 = int_to_ptr.vmem [resolvable:$true] %s32_s22 }
   0x4   :  { %s577_s27 = smov 4   ;;  %s578_s28 = smov [#allocation2]  }
   0x5   :  { %38 = dma.hbm_to_vmem [thread:$0]  %s31_s20, 2048, %s33_s22, [#allocation6], %s576_s26, %s576_s26, %s577_s27  }
   0x6   :  { %s19_s29 = sshll.u32 %s578_s28, 4  ;;  %s579_s30 = smov 256   ;;  %s20_s29 = int_to_ptr.vmem [resolvable:$true] %s19_s29 }
   0x7   :  { %s580_s6 = smov 16   ;;  %s45_s8 = sshll.u32 %s636_s3, 4  ;;  %s46_s8 = int_to_ptr.hbm [resolvable:$true] %s45_s8 }
   0x8   :  { %25 = dma.hbm_to_vmem [thread:$0]  %s18_s25, 512, %s20_s29, [#allocation3], %s579_s30, %s579_s30, %s580_s6  }
   0x9   :  { %s581_s9 = smov [#allocation7]  }
   0xa   :  { %s47_s10 = sshll.u32 %s581_s9, 4  ;;  %s48_s10 = int_to_ptr.vmem [resolvable:$true] %s47_s10 }
   0xb   :  { %53 = dma.hbm_to_vmem [thread:$0]  %s46_s8, 1024, %s48_s10, [#allocation6], %s576_s26, %s576_s26, %s577_s27  }
   0xc   :  { %569 = dma.done.wait [#allocation3], 512  }
   0xd   :  { %570 = vsyncadd [#allocation3], 4294966784 }
   0xe   :  { %571 = dma.done.wait [#allocation6], 3072  }
   0xf   :  { %572 = vsyncadd [#allocation6], 4294964224  ;;  %v444_v0 = vld [vmem:[#allocation5 + $0x38] sm:$0xff]  ;;  %v443_v2 = vld [vmem:[#allocation5 + $0x30] sm:$0xff]  ;;  %s582_s13 = smov [#allocation8]   ;;  %s327_s16 = sshll.u32 %s638_s5, 4  ;;  %s328_s16 = int_to_ptr.hbm [resolvable:$true] %s327_s16 }
  0x10   :  { %v452_v1 = vld [vmem:[#allocation5 + $0x78] sm:$0xff]  ;;  %206 = vmatpush.bf16.msra.mxu0 %v444_v0  ;;  %v451_v3 = vld [vmem:[#allocation5 + $0x70] sm:$0xff]  ;;  %v442_v4 = vld [vmem:[#allocation5 + $0x28] sm:$0xff]  ;;  %s325_s14 = sshll.u32 %s582_s13, 4  ;;  %s583_s17 = smov 128   ;;  %s326_s14 = int_to_ptr.vmem [resolvable:$true] %s325_s14 }
  0x11   :  { %220 = vmatpush.bf16.msra.mxu1 %v452_v1  ;;  %v450_v5 = vld [vmem:[#allocation5 + $0x68] sm:$0xff]  ;;  %v460_v6 = vld [vmem:[#allocation7 + $0x38] sm:$0xff]  ;;  %v459_v7 = vld [vmem:[#allocation7 + $0x30] sm:$0xff]  ;;  %s584_s18 = smov 8  }
  0x12   :  { %305 = vmatpush.bf16.msra.mxu2 %v460_v6  ;;  %v441_v8 = vld [vmem:[#allocation5 + $0x20] sm:$0xff]  ;;  %v458_v10 = vld [vmem:[#allocation7 + $0x28] sm:$0xff]  ;;  %v440_v11 = vld [vmem:[#allocation5 + $0x18] sm:$0xff] }
  0x13   :  { %v449_v9 = vld [vmem:[#allocation5 + $0x60] sm:$0xff]  ;;  %v448_v12 = vld [vmem:[#allocation5 + $0x58] sm:$0xff]  ;;  %v439_v14 = vld [vmem:[#allocation5 + $0x10] sm:$0xff] }
  0x14   :  { %207 = vmatpush.bf16.msra.mxu0 %v443_v2  ;;  %v457_v13 = vld [vmem:[#allocation7 + $0x20] sm:$0xff]  ;;  %v447_v15 = vld [vmem:[#allocation5 + $0x50] sm:$0xff]  ;;  %v438_v16 = vld [vmem:[#allocation5 + $0x8] sm:$0xff] }
  0x15   :  { %221 = vmatpush.bf16.msra.mxu1 %v451_v3  ;;  %v446_v17 = vld [vmem:[#allocation5 + $0x48] sm:$0xff]  ;;  %v437_v18 = vld [vmem:[#allocation5] sm:$0xff]  ;;  %v70_v21 = vld [vmem:[#allocation2 + $0x10] sm:$0xff] }
  0x16   :  { %306 = vmatpush.bf16.msra.mxu2 %v459_v7  ;;  %v445_v19 = vld [vmem:[#allocation5 + $0x40] sm:$0xff]  ;;  %v69_v22 = vld [vmem:[#allocation2 + $0x8] sm:$0xff]  ;;  %v71_v23 = vld [vmem:[#allocation2 + $0x18] sm:$0xff] }
  0x17   :  { %v68_v20 = vld [vmem:[#allocation2] sm:$0xff]  ;;  %v73_v25 = vpack.c.bf16 %v71_v23, %v69_v22  ;;  %v456_v26 = vld [vmem:[#allocation7 + $0x18] sm:$0xff]  ;;  %v455_v27 = vld [vmem:[#allocation7 + $0x10] sm:$0xff] }
  0x18   :  { %208 = vmatpush.bf16.msra.mxu0 %v442_v4  ;;  %v72_v24 = vpack.c.bf16 %v70_v21, %v68_v20  ;;  %v454_v28 = vld [vmem:[#allocation7 + $0x8] sm:$0xff]  ;;  %v453_v29 = vld [vmem:[#allocation7] sm:$0xff] }
  0x19   :  { %222 = vmatpush.bf16.msra.mxu1 %v450_v5  ;;  %v471_v32 = vld [vmem:[%s635_s2] ss:$0 sm:$0xff] }
  0x1a   :  { %307 = vmatpush.bf16.msra.mxu2 %v458_v10  ;;  %v472_v42 = vld [vmem:[%s637_s4] ss:$0 sm:$0xff] }
  0x1c   :  { %209 = vmatpush.bf16.msra.mxu0 %v441_v8 }
  0x1d   :  { %223 = vmatpush.bf16.msra.mxu1 %v449_v9 }
  0x1e   :  { %308 = vmatpush.bf16.msra.mxu2 %v457_v13 }
  0x20   :  { %210 = vmatpush.bf16.msra.mxu0 %v440_v11 }
  0x21   :  { %224 = vmatpush.bf16.msra.mxu1 %v448_v12 }
  0x22   :  { %309 = vmatpush.bf16.msra.mxu2 %v456_v26 }
  0x24   :  { %211 = vmatpush.bf16.msra.mxu0 %v439_v14 }
  0x25   :  { %225 = vmatpush.bf16.msra.mxu1 %v447_v15 }
  0x26   :  { %310 = vmatpush.bf16.msra.mxu2 %v455_v27 }
  0x28   :  { %212 = vmatpush.bf16.msra.mxu0 %v438_v16 }
  0x29   :  { %226 = vmatpush.bf16.msra.mxu1 %v446_v17 }
  0x2a   :  { %311 = vmatpush.bf16.msra.mxu2 %v454_v28 }
  0x2c   :  { %213 = vmatpush.bf16.msra.mxu0 %v437_v18 }
  0x2d   :  { %227 = vmatpush.bf16.msra.mxu1 %v445_v19 }
  0x2e   :  { %312 = vmatpush.bf16.msra.mxu2 %v453_v29 }
  0x2f   :  { %214 = vmatmul.bf16.vlgmr.msra.gmra.mxu0 %v72_v24 }
  0x30   :  { %228 = vmatmul.bf16.vlgmr.msra.gmra.mxu1 %v73_v25 }
  0xac   :  { %v215_v30 = vpop.f32.mrf.mxu0 }
  0xad   :  { %v229_v31 = vpop.f32.mrf.mxu1  ;;  %v216_v33 = vadd.f32 %v471_v32, %v215_v30 }
  0xaf   :  { %v230_v35 = vadd.f32 %v229_v31, %v216_v33 }
  0xb1   :  { %v234_v39 = vmax.f32 %v230_v35, 0.0 }
  0xb4   :  { %v217_v34 = vpop.f32.mrf.mxu0 }
  0xb5   :  { %v218_v36 = vadd.f32 %v471_v32, %v217_v34  ;;  %v231_v37 = vpop.f32.mrf.mxu1 }
  0xb7   :  { %v232_v38 = vadd.f32 %v231_v37, %v218_v36 }
  0xb9   :  { %v235_v40 = vmax.f32 %v232_v38, 0.0 }
  0xbb   :  { %v236_v41 = vpack.c.bf16 %v235_v40, %v234_v39 }
  0xbd   :  { %313 = vmatmul.bf16.vlgmr.msra.gmra.mxu2 %v236_v41 }
 0x140   :  { %v314_v43 = vpop.f32.mrf.mxu2 }
 0x141   :  { %v315_v44 = vadd.f32 %v472_v42, %v314_v43 }
 0x143   :  { %319 = vst [vmem:[#allocation8] sm:$0xff] %v315_v44 }
 0x148   :  { %v316_v45 = vpop.f32.mrf.mxu2 }
 0x149   :  { %v317_v46 = vadd.f32 %v472_v42, %v316_v45 }
 0x14b   :  { %320 = vst [vmem:[#allocation8 + $0x8] sm:$0xff] %v317_v46 }
 0x14c   :  { %333 = dma.vmem_to_hbm [thread:$0]  %s326_s14, 256, %s328_s16, [#allocation4], %s583_s17, %s583_s17, %s584_s18  }
 0x14d   :  { %573 = dma.done.wait [#allocation4], 256  }
 0x14e   :  { %574 = vsyncadd [#allocation4], 4294967040 }
 0x14f   :  { %338 = vsyncpa [#allocation3], 1 }
 0x150   :  { %339 = vsyncpa [#allocation6], 1 }
 0x151   :  { %340 = vsyncpa [#allocation4], 1 }

</bundles_post_ra>
